<compile_context>
chip_gen: v7x
topology: tpu7x:2x2x1
jax: 0.10.0
libtpu: 0.0.40
codegen_flags: <defaults>
</compile_context>

<pallas_src>
import jax
import jax.numpy as jnp
from jax.experimental import pallas as pl
from jax.experimental.pallas import tpu as pltpu


def _encoder_kernel(x_ref, w1_ref, b1_ref, fw_ref, fb_ref, out_ref):
    # x:  [tb, d_in]    w1: [d_in, H]    b1: [1, H]
    # fw: [H, HD_pad]   fb: [1, HD_pad]  out: [tb, HD_pad]
    x = x_ref[...]
    d_in = x.shape[1]
    w1 = w1_ref[...]

    if d_in <= 8:
        # A K=4 matmul would waste an MXU pass (plus its result-FIFO drain) on
        # the critical path before the big matmul; do it as d_in broadcast
        # multiply-adds on the VPU instead.
        h = b1_ref[...] + x[:, 0:1] * w1[0:1, :]
        for k in range(1, d_in):
            h = h + x[:, k:k + 1] * w1[k:k + 1, :]
    else:
        h = jnp.dot(x, w1, preferred_element_type=jnp.float32) + b1_ref[...]
    h = jnp.maximum(h, 0.0)                                   # ReLU (VPU)

    fw = fw_ref[...]
    if fw.dtype == jnp.bfloat16:                              # bf16 MXU operands
        h = h.astype(jnp.bfloat16)
    hd = jnp.dot(h, fw, preferred_element_type=jnp.float32) + fb_ref[...]
    out_ref[...] = jnp.tanh(hd).astype(out_ref.dtype)         # EUP + narrow store


def neural_hdc_encode(x, w1, b1, w2, b2, proj, *, block_b=1024,
                      use_bf16=False, out_dtype=jnp.bfloat16):
    B, d_in = x.shape
    h_dim = w1.shape[1]
    hd = proj.shape[1]

    # One-time algebraic fusion of the second Linear into the HD projection:
    #   tanh((relu(x@w1+b1) @ w2 + b2) @ proj)
    # = tanh( relu(x@w1+b1) @ (w2@proj) + (b2@proj) )
    hi = jax.lax.Precision.HIGHEST
    fused_w = jnp.dot(w2, proj, precision=hi)                 # [H, HD]
    fused_b = jnp.dot(b2, proj, precision=hi)                 # [1, HD]

    # Lane-dense output: pad HD up to a multiple of 128 (1000 -> 1024).
    hd_pad = pl.cdiv(hd, 128) * 128
    if hd_pad != hd:
        fused_w = jnp.pad(fused_w, ((0, 0), (0, hd_pad - hd)))
        fused_b = jnp.pad(fused_b, ((0, 0), (0, hd_pad - hd)))
    if use_bf16:
        # Cast the invariant weight once here (halves its DMA/VMEM footprint),
        # never per grid step inside the kernel.
        fused_w = fused_w.astype(jnp.bfloat16)

    # ---- batch tiling ---------------------------------------------------
    #  * minimal padding: each tile rounded only to the sublane granule,
    #  * >=2 grid steps once B is big enough so v7x's 2 TensorCores both work,
    #  * tiles capped at block_b rows to stay well inside scoped VMEM.
    out_itemsize = jnp.dtype(out_dtype).itemsize
    granule = 16 if (out_itemsize < 4 or use_bf16) else 8     # packed-row safe
    n_tiles = pl.cdiv(B, block_b)
    if n_tiles == 1 and B >= 512:
        n_tiles = 2
    tb = max(granule, pl.cdiv(pl.cdiv(B, n_tiles), granule) * granule)
    b_pad = n_tiles * tb
    if b_pad != B:
        x = jnp.pad(x, ((0, b_pad - B), (0, 0)))

    w_itemsize = 2 if use_bf16 else 4
    flops = 2 * b_pad * (d_in * h_dim + h_dim * hd_pad)
    bytes_accessed = (4 * (b_pad * d_in + d_in * h_dim + h_dim + hd_pad)
                      + w_itemsize * h_dim * hd_pad
                      + out_itemsize * b_pad * hd_pad)

    # Explicit scoped-VMEM limit: v5e's default is only 16 MiB and large batch
    # tiles (double-buffered x/out + f32 intermediates) would exceed it.
    per_step = (2 * (tb * d_in * 4 + tb * hd_pad * out_itemsize)   # x, out (x2 buf)
                + 2 * (d_in * h_dim * 4 + h_dim * 4
                       + h_dim * hd_pad * w_itemsize + hd_pad * 4)  # weights (x2 buf)
                + tb * (h_dim + hd_pad) * 4)                        # f32 temporaries
    vmem_limit = int(min(max(2 * per_step, 32 << 20), 48 << 20))

    out = pl.pallas_call(
        _encoder_kernel,
        out_shape=jax.ShapeDtypeStruct((b_pad, hd_pad), out_dtype),
        grid=(n_tiles,),
        in_specs=[
            pl.BlockSpec((tb, d_in), lambda i: (i, 0)),        # x, tiled over batch
            pl.BlockSpec((d_in, h_dim), lambda i: (0, 0)),     # w1 (invariant)
            pl.BlockSpec((1, h_dim), lambda i: (0, 0)),        # b1 (invariant)
            pl.BlockSpec((h_dim, hd_pad), lambda i: (0, 0)),   # fused_w (invariant)
            pl.BlockSpec((1, hd_pad), lambda i: (0, 0)),       # fused_b (invariant)
        ],
        out_specs=pl.BlockSpec((tb, hd_pad), lambda i: (i, 0)),
        compiler_params=pltpu.CompilerParams(
            dimension_semantics=("parallel",),
            vmem_limit_bytes=vmem_limit),
        cost_estimate=pl.CostEstimate(
            flops=flops,
            transcendentals=b_pad * hd_pad,
            bytes_accessed=bytes_accessed),
    )(x, w1, b1, fused_w, fused_b)

    return out[:B, :hd]


def make_params(key, d_in=4, h_dim=64, hd_dim=1000):
    k1, k2, k3, k4, k5 = jax.random.split(key, 5)
    # Shapes from NeuralHDCEncoder.__init__ (weights stored [in, out]).
    bound1 = 1.0 / jnp.sqrt(d_in)
    w1 = jax.random.uniform(k1, (d_in, h_dim), jnp.float32, -bound1, bound1)
    b1 = jax.random.uniform(k2, (1, h_dim), jnp.float32, -bound1, bound1)
    bound2 = 1.0 / jnp.sqrt(h_dim)
    w2 = jax.random.uniform(k3, (h_dim, d_in), jnp.float32, -bound2, bound2)
    b2 = jax.random.uniform(k4, (1, d_in), jnp.float32, -bound2, bound2)
    # projection = randn(d_in, hd_dim); projection /= norm(projection, dim=0)
    proj = jax.random.normal(k5, (d_in, hd_dim), jnp.float32)
    proj = proj / jnp.linalg.norm(proj, axis=0, keepdims=True)
    return w1, b1, w2, b2, proj


def reference(x, w1, b1, w2, b2, proj):
    h = jnp.maximum(x @ w1 + b1, 0.0)
    e = h @ w2 + b2
    return jnp.tanh(e @ proj)


if __name__ == "__main__":
    key = jax.random.PRNGKey(0)
    kx, kp = jax.random.split(key)

    B, D_IN, H, HD = 8, 4, 64, 1000
    x = jax.random.normal(kx, (B, D_IN), jnp.float32)
    w1, b1, w2, b2, proj = make_params(kp, D_IN, H, HD)
    ref = reference(x, w1, b1, w2, b2, proj)

    # f32-output path: tight tolerance (fusion only re-associates float sums).
    out_f32 = jax.block_until_ready(
        neural_hdc_encode(x, w1, b1, w2, b2, proj, out_dtype=jnp.float32))
    assert out_f32.shape == (B, HD) and out_f32.dtype == jnp.float32
    assert jnp.allclose(out_f32, ref, atol=1e-4, rtol=1e-4), float(
        jnp.max(jnp.abs(out_f32 - ref)))

    # Default bf16-output path: halves writeback bytes; tanh output is in
    # [-1,1] so bf16 rounding is ~2e-3 absolute.
    out_bf16 = jax.block_until_ready(neural_hdc_encode(x, w1, b1, w2, b2, proj))
    assert out_bf16.shape == (B, HD) and out_bf16.dtype == jnp.bfloat16
    assert jnp.allclose(out_bf16.astype(jnp.float32), ref, atol=1e-2, rtol=1e-2), float(
        jnp.max(jnp.abs(out_bf16.astype(jnp.float32) - ref)))

    print("KERNEL_OK")
</pallas_src>

<mosaic_0001>
module attributes {stable_mosaic.version = 11 : i64} {
  func.func @_encoder_kernel(%arg0: i32, %arg1: memref<8x4xf32, #tpu.memory_space<vmem>>, %arg2: memref<4x64xf32, #tpu.memory_space<vmem>>, %arg3: memref<1x64xf32, #tpu.memory_space<vmem>>, %arg4: memref<64x1024xf32, #tpu.memory_space<vmem>>, %arg5: memref<1x1024xf32, #tpu.memory_space<vmem>>, %arg6: memref<8x1024xf32, #tpu.memory_space<vmem>>) attributes {dimension_semantics = [#tpu.dimension_semantics<parallel>], iteration_bounds = array<i64: 1>, scalar_prefetch = 0 : i64, scratch_operands = 0 : i64, tpu.core_type = #tpu.core_type<tc>, window_params = [{transform_indices = @transform_0, window_bounds = array<i64: 8, 4>}, {pipeline_mode = #tpu.pipeline_mode<synchronous>, transform_indices = @transform_1, window_bounds = array<i64: 4, 64>}, {pipeline_mode = #tpu.pipeline_mode<synchronous>, transform_indices = @transform_2, window_bounds = array<i64: 1, 64>}, {pipeline_mode = #tpu.pipeline_mode<synchronous>, transform_indices = @transform_3, window_bounds = array<i64: 64, 1024>}, {pipeline_mode = #tpu.pipeline_mode<synchronous>, transform_indices = @transform_4, window_bounds = array<i64: 1, 1024>}, {transform_indices = @transform_5, window_bounds = array<i64: 8, 1024>}]} {
    %c0 = arith.constant 0 : index
    %c0_0 = arith.constant 0 : index
    %0 = vector.load %arg1[%c0, %c0_0] : memref<8x4xf32, #tpu.memory_space<vmem>>, vector<8x4xf32>
    %c0_1 = arith.constant 0 : index
    %c0_2 = arith.constant 0 : index
    %1 = vector.load %arg2[%c0_1, %c0_2] : memref<4x64xf32, #tpu.memory_space<vmem>>, vector<4x64xf32>
    %c0_3 = arith.constant 0 : index
    %c0_4 = arith.constant 0 : index
    %2 = vector.load %arg3[%c0_3, %c0_4] : memref<1x64xf32, #tpu.memory_space<vmem>>, vector<1x64xf32>
    %3 = vector.extract_strided_slice %0 {offsets = [0, 0], sizes = [8, 1], strides = [1, 1]} : vector<8x4xf32> to vector<8x1xf32>
    %4 = vector.extract_strided_slice %1 {offsets = [0, 0], sizes = [1, 64], strides = [1, 1]} : vector<4x64xf32> to vector<1x64xf32>
    %5 = vector.broadcast %3 : vector<8x1xf32> to vector<8x64xf32>
    %6 = vector.broadcast %4 : vector<1x64xf32> to vector<8x64xf32>
    %7 = arith.mulf %5, %6 : vector<8x64xf32>
    %8 = vector.broadcast %2 : vector<1x64xf32> to vector<8x64xf32>
    %9 = arith.addf %8, %7 : vector<8x64xf32>
    %10 = vector.extract_strided_slice %0 {offsets = [0, 1], sizes = [8, 1], strides = [1, 1]} : vector<8x4xf32> to vector<8x1xf32>
    %11 = vector.extract_strided_slice %1 {offsets = [1, 0], sizes = [1, 64], strides = [1, 1]} : vector<4x64xf32> to vector<1x64xf32>
    %12 = vector.broadcast %10 : vector<8x1xf32> to vector<8x64xf32>
    %13 = vector.broadcast %11 : vector<1x64xf32> to vector<8x64xf32>
    %14 = arith.mulf %12, %13 : vector<8x64xf32>
    %15 = arith.addf %9, %14 : vector<8x64xf32>
    %16 = vector.extract_strided_slice %0 {offsets = [0, 2], sizes = [8, 1], strides = [1, 1]} : vector<8x4xf32> to vector<8x1xf32>
    %17 = vector.extract_strided_slice %1 {offsets = [2, 0], sizes = [1, 64], strides = [1, 1]} : vector<4x64xf32> to vector<1x64xf32>
    %18 = vector.broadcast %16 : vector<8x1xf32> to vector<8x64xf32>
    %19 = vector.broadcast %17 : vector<1x64xf32> to vector<8x64xf32>
    %20 = arith.mulf %18, %19 : vector<8x64xf32>
    %21 = arith.addf %15, %20 : vector<8x64xf32>
    %22 = vector.extract_strided_slice %0 {offsets = [0, 3], sizes = [8, 1], strides = [1, 1]} : vector<8x4xf32> to vector<8x1xf32>
    %23 = vector.extract_strided_slice %1 {offsets = [3, 0], sizes = [1, 64], strides = [1, 1]} : vector<4x64xf32> to vector<1x64xf32>
    %24 = vector.broadcast %22 : vector<8x1xf32> to vector<8x64xf32>
    %25 = vector.broadcast %23 : vector<1x64xf32> to vector<8x64xf32>
    %26 = arith.mulf %24, %25 : vector<8x64xf32>
    %27 = arith.addf %21, %26 : vector<8x64xf32>
    %cst = arith.constant 0.000000e+00 : f32
    %28 = vector.broadcast %cst : f32 to vector<8x64xf32>
    %29 = arith.maximumf %27, %28 : vector<8x64xf32>
    %c0_5 = arith.constant 0 : index
    %c0_6 = arith.constant 0 : index
    %30 = vector.load %arg4[%c0_5, %c0_6] : memref<64x1024xf32, #tpu.memory_space<vmem>>, vector<64x1024xf32>
    %cst_7 = arith.constant dense<0.000000e+00> : vector<8x1024xf32>
    %31 = tpu.matmul %29, %30, %cst_7 {dimension_numbers = #tpu.dot_dimension_numbers<[1], [0], [0], [1], [0, 0, 1, 1], [], []>} : vector<8x64xf32>, vector<64x1024xf32>, vector<8x1024xf32> -> vector<8x1024xf32>
    %c0_8 = arith.constant 0 : index
    %c0_9 = arith.constant 0 : index
    %32 = vector.load %arg5[%c0_8, %c0_9] : memref<1x1024xf32, #tpu.memory_space<vmem>>, vector<1x1024xf32>
    %33 = vector.broadcast %32 : vector<1x1024xf32> to vector<8x1024xf32>
    %34 = arith.addf %31, %33 : vector<8x1024xf32>
    %35 = math.tanh %34 : vector<8x1024xf32>
    %c0_10 = arith.constant 0 : index
    %c0_11 = arith.constant 0 : index
    %36 = vector.load %arg6[%c0_10, %c0_11] : memref<8x1024xf32, #tpu.memory_space<vmem>>, vector<8x1024xf32>
    tpu.vector_store %arg6[%c0_10, %c0_11], %35 {strides = array<i32>} : memref<8x1024xf32, #tpu.memory_space<vmem>>, vector<8x1024xf32>,
    return
  }
  func.func @transform_0(%arg0: i32) -> (i32, i32) {
    %c0_i32 = arith.constant 0 : i32
    %c0_i32_0 = arith.constant 0 : i32
    return %arg0, %c0_i32 : i32, i32
  }
  func.func @transform_1(%arg0: i32) -> (i32, i32) {
    %c0_i32 = arith.constant 0 : i32
    %c0_i32_0 = arith.constant 0 : i32
    %c0_i32_1 = arith.constant 0 : i32
    return %c0_i32, %c0_i32_0 : i32, i32
  }
  func.func @transform_2(%arg0: i32) -> (i32, i32) {
    %c0_i32 = arith.constant 0 : i32
    %c0_i32_0 = arith.constant 0 : i32
    %c0_i32_1 = arith.constant 0 : i32
    return %c0_i32, %c0_i32_0 : i32, i32
  }
  func.func @transform_3(%arg0: i32) -> (i32, i32) {
    %c0_i32 = arith.constant 0 : i32
    %c0_i32_0 = arith.constant 0 : i32
    %c0_i32_1 = arith.constant 0 : i32
    return %c0_i32, %c0_i32_0 : i32, i32
  }
  func.func @transform_4(%arg0: i32) -> (i32, i32) {
    %c0_i32 = arith.constant 0 : i32
    %c0_i32_0 = arith.constant 0 : i32
    %c0_i32_1 = arith.constant 0 : i32
    return %c0_i32, %c0_i32_0 : i32, i32
  }
  func.func @transform_5(%arg0: i32) -> (i32, i32) {
    %c0_i32 = arith.constant 0 : i32
    %c0_i32_0 = arith.constant 0 : i32
    return %arg0, %c0_i32 : i32, i32
  }
}

</mosaic_0001>

<bundles_post_ra>
// kernel: tpu_custom_call.1
= control target key start
LH: loop header
LB: loop body
LE: loop exit
PB: predicated region body
PF: predicated region fallthrough
CT: control target
= control target key end

     0   :  { %10 = vsyncpa [#allocation3], 0  ;;  %s767_s0 = inlined_call_operand.vmem [shape: f32[8,4], index: 0, kind: input, shape index: {}]   ;;  %s768_s1 = inlined_call_operand.vmem [shape: f32[4,64], index: 1, kind: input, shape index: {}]   ;;  %s769_s2 = inlined_call_operand.vmem [shape: f32[1,64], index: 2, kind: input, shape index: {}]   ;;  %s770_s3 = inlined_call_operand.hbm [shape: f32[64,1024], index: 3, kind: input, shape index: {}]   ;;  %s771_s4 = inlined_call_operand.vmem [shape: f32[1,1024], index: 4, kind: input, shape index: {}]   ;;  %s772_s5 = inlined_call_operand.hbm [shape: f32[8,1024], index: 5, kind: output, shape index: {}]  }
   0x1   :  { %11 = vsyncpa [#allocation4], 0  ;;  %s658_s18 = smov [#allocation2]   ;;  %s610_s22 = scalar_lea.hbm %s770_s3, 8192 }
   0x2   :  { %s23_s19 = sshll.u32 %s658_s18, 4  ;;  %p611_p0 = scmp.ne.s32.totalorder %s770_s3, %s610_s22  ;;  %s24_s19 = int_to_ptr.vmem [resolvable:$true] %s23_s19 }
   0x3   :  { %p614_p1 = scmp.lt.u32.totalorder %s610_s22, %s770_s3 }
   0x5   :  { %p616_p2 = pnand %p614_p1, %p611_p0 }
   0x7   :  { %619 = shalt.err (!%p616_p2)
}
   0x8   :  { %s620_s27 = scalar_lea.vmem %s24_s19, 8192  ;;  %p625_p4 = scmp.lt.s32.totalorder %s24_s19, %s24_s19 }
   0x9   :  { %p621_p3 = scmp.ne.s32.totalorder %s24_s19, %s620_s27  ;;  %p626_p5 = scmp.lt.s32.totalorder %s620_s27, %s620_s27 }
   0xb   :  { %p627_p6 = por %p626_p5, %p625_p4 }
   0xd   :  { %p628_p7 = pnand %p627_p6, %p621_p3 }
   0xf   :  { %631 = shalt.err (!%p628_p7)
}
  0x10   :  { %s659_s28 = smov 1024   ;;  %s660_s29 = smov 64  }
  0x11   :  { %29 = dma.hbm_to_vmem [thread:$0]  %s770_s3, 8192, %s24_s19, [#allocation3], %s659_s28, %s659_s28, %s660_s29  }
  0x12   :  { %654 = dma.done.wait [#allocation3], 8192  }
  0x13   :  { %655 = vsyncadd [#allocation3], 4294959104  ;;  %v661_v0 = vmov 0   ;;  %v662_v1 = vmov 2   ;;  %v35_v2 = vld [vmem:[%s767_s0] sm:$0xff]  ;;  %v87_v3 = vld [vmem:[#allocation2 + $0x8] sm:$0xff]  ;;  %v43_v60 = vlaneseq }
  0x14   :  { %589 = vset.pattern.permute.xlu0 %v661_v0  ;;  %591 = vset.pattern.permute.xlu1 %v662_v1  ;;  %v95_v4 = vld [vmem:[#allocation2 + $0x48] sm:$0xff]  ;;  %v89_v6 = vld [vmem:[#allocation2 + $0x18] sm:$0xff]  ;;  %v86_v8 = vld [vmem:[#allocation2] sm:$0xff]  ;;  %v663_v19 = vmov 1   ;;  %v664_v20 = vmov 3   ;;  %v665_v59 = vmov 0.0  }
  0x15   :  { %40 = vperm.xlu0 %589, %v35_v2   ;;  %66 = vperm.xlu1 %591, %v35_v2   ;;  %v516_v5 = vpack.c.bf16 %v95_v4, %v87_v3  ;;  %v97_v7 = vld [vmem:[#allocation2 + $0x58] sm:$0xff]  ;;  %v94_v10 = vld [vmem:[#allocation2 + $0x40] sm:$0xff]  ;;  %v88_v11 = vld [vmem:[#allocation2 + $0x10] sm:$0xff]  ;;  %v714_v61 = vshrl.u32 %v43_v60, 7  ;;  %vm192_vm0 = vcmask 523264  }
  0x16   :  { %v532_v9 = vpack.c.bf16 %v97_v7, %v89_v6  ;;  %v96_v12 = vld [vmem:[#allocation2 + $0x50] sm:$0xff]  ;;  %v518_v13 = vpack.c.bf16 %v94_v10, %v86_v8  ;;  %v103_v15 = vld [vmem:[#allocation2 + $0x88] sm:$0xff]  ;;  %v105_v17 = vld [vmem:[#allocation2 + $0x98] sm:$0xff]  ;;  %260 = vmatprep.mubr.f32.mxu0 %v665_v59  ;;  %331 = vmatprep.mubr.f32.mxu1 %v665_v59 }
  0x17   :  { %517 = vmatprep.subr.bf16.mxu0 %v516_v5  ;;  %v534_v14 = vpack.c.bf16 %v96_v12, %v88_v11  ;;  %v111_v16 = vld [vmem:[#allocation2 + $0xc8] sm:$0xff]  ;;  %v113_v18 = vld [vmem:[#allocation2 + $0xd8] sm:$0xff]  ;;  %v102_v23 = vld [vmem:[#allocation2 + $0x80] sm:$0xff]  ;;  %v45_v62 = vsub.s32 0, %v714_v61  ;;  %v61_v1 = vsub.s32 1, %v714_v61  ;;  %v71_v3 = vsub.s32 2, %v714_v61 }
  0x18   :  { %533 = vmatprep.subr.bf16.mxu1 %v532_v9  ;;  %v520_v21 = vpack.c.bf16 %v111_v16, %v103_v15  ;;  %v536_v22 = vpack.c.bf16 %v113_v18, %v105_v17  ;;  %v110_v24 = vld [vmem:[#allocation2 + $0xc0] sm:$0xff]  ;;  %v104_v25 = vld [vmem:[#allocation2 + $0x90] sm:$0xff]  ;;  %v119_v27 = vld [vmem:[#allocation2 + $0x108] sm:$0xff]  ;;  %519 = vmatpush1.bf16.msra.mxu0 %v518_v13  ;;  %v81_v5 = vsub.s32 3, %v714_v61 }
  0x19   :  { %590 = vset.pattern.permute.xlu0 %v663_v19  ;;  %592 = vset.pattern.permute.xlu1 %v664_v20  ;;  %v112_v26 = vld [vmem:[#allocation2 + $0xd0] sm:$0xff]  ;;  %v127_v28 = vld [vmem:[#allocation2 + $0x148] sm:$0xff]  ;;  %v522_v29 = vpack.c.bf16 %v110_v24, %v102_v23  ;;  %v121_v31 = vld [vmem:[#allocation2 + $0x118] sm:$0xff] }
  0x1a   :  { %56 = vperm.xlu0 %590, %v35_v2   ;;  %76 = vperm.xlu1 %592, %v35_v2   ;;  %v538_v30 = vpack.c.bf16 %v112_v26, %v104_v25  ;;  %v129_v32 = vld [vmem:[#allocation2 + $0x158] sm:$0xff]  ;;  %v118_v33 = vld [vmem:[#allocation2 + $0x100] sm:$0xff]  ;;  %v524_v34 = vpack.c.bf16 %v127_v28, %v119_v27  ;;  %v120_v37 = vld [vmem:[#allocation2 + $0x110] sm:$0xff] }
  0x1b   :  { %535 = vmatpush1.bf16.msra.mxu1 %v534_v14  ;;  %521 = vmatprep.subr.bf16.mxu0 %v520_v21  ;;  %v540_v35 = vpack.c.bf16 %v129_v32, %v121_v31  ;;  %v126_v36 = vld [vmem:[#allocation2 + $0x140] sm:$0xff]  ;;  %v128_v38 = vld [vmem:[#allocation2 + $0x150] sm:$0xff]  ;;  %v135_v39 = vld [vmem:[#allocation2 + $0x188] sm:$0xff] }
  0x1c   :  { %537 = vmatprep.subr.bf16.mxu1 %v536_v22  ;;  %v143_v40 = vld [vmem:[#allocation2 + $0x1c8] sm:$0xff]  ;;  %v137_v41 = vld [vmem:[#allocation2 + $0x198] sm:$0xff]  ;;  %523 = vmatpush1.bf16.msra.mxu0 %v522_v29  ;;  %v526_v43 = vpack.c.bf16 %v126_v36, %v118_v33  ;;  %v542_v44 = vpack.c.bf16 %v128_v38, %v120_v37  ;;  %v134_v45 = vld [vmem:[#allocation2 + $0x180] sm:$0xff] }
  0x1d   :  { %v145_v42 = vld [vmem:[#allocation2 + $0x1d8] sm:$0xff]  ;;  %v142_v46 = vld [vmem:[#allocation2 + $0x1c0] sm:$0xff]  ;;  %525 = vmatprep.subr.bf16.mxu0 %v524_v34  ;;  %v528_v47 = vpack.c.bf16 %v143_v40, %v135_v39  ;;  %v136_v49 = vld [vmem:[#allocation2 + $0x190] sm:$0xff] }
  0x1e   :  { %593 = vset.pattern.permute.xlu0 %v664_v20  ;;  %v544_v48 = vpack.c.bf16 %v145_v42, %v137_v41  ;;  %v144_v50 = vld [vmem:[#allocation2 + $0x1d0] sm:$0xff]  ;;  %v91_v51 = vld [vmem:[#allocation2 + $0x28] sm:$0xff]  ;;  %v93_v53 = vld [vmem:[#allocation2 + $0x38] sm:$0xff]  ;;  %v530_v55 = vpack.c.bf16 %v142_v46, %v134_v45 }
  0x1f   :  { %539 = vmatpush1.bf16.msra.mxu1 %v538_v30  ;;  %v99_v52 = vld [vmem:[#allocation2 + $0x68] sm:$0xff]  ;;  %v101_v54 = vld [vmem:[#allocation2 + $0x78] sm:$0xff]  ;;  %v546_v56 = vpack.c.bf16 %v144_v50, %v136_v49  ;;  %v90_v18 = vld [vmem:[#allocation2 + $0x20] sm:$0xff] }
  0x20   :  { %541 = vmatprep.subr.bf16.mxu1 %v540_v35  ;;  %527 = vmatpush1.bf16.msra.mxu0 %v526_v43  ;;  %v548_v57 = vpack.c.bf16 %v99_v52, %v91_v51  ;;  %v564_v58 = vpack.c.bf16 %v101_v54, %v93_v53  ;;  %v36_v63 = vld [vmem:[%s768_s1] sm:$0xf]  ;;  %v98_v19 = vld [vmem:[#allocation2 + $0x60] sm:$0xff]  ;;  %v92_v21 = vld [vmem:[#allocation2 + $0x30] sm:$0xff] }
  0x21   :  { %529 = vmatprep.subr.bf16.mxu0 %v528_v47  ;;  %v46_v0 = vrot.slane %v36_v63, %v45_v62  ;;  %v62_v7 = vrot.slane %v36_v63, %v61_v1  ;;  %v511_v8 = vld [vmem:[%s769_s2] ss:$0 sm:$0xff]  ;;  %v72_v9 = vrot.slane %v36_v63, %v71_v3  ;;  %v82_v10 = vrot.slane %v36_v63, %v81_v5  ;;  %v100_v22 = vld [vmem:[#allocation2 + $0x70] sm:$0xff]  ;;  %v107_v23 = vld [vmem:[#allocation2 + $0xa8] sm:$0xff] }
  0x22   :  { %v115_v24 = vld [vmem:[#allocation2 + $0xe8] sm:$0xff]  ;;  %v109_v25 = vld [vmem:[#allocation2 + $0xb8] sm:$0xff]  ;;  %v550_v28 = vpack.c.bf16 %v98_v19, %v90_v18  ;;  %v566_v29 = vpack.c.bf16 %v100_v22, %v92_v21  ;;  %v106_v30 = vld [vmem:[#allocation2 + $0xa0] sm:$0xff] }
  0x23   :  { %543 = vmatpush1.bf16.msra.mxu1 %v542_v44  ;;  %v117_v26 = vld [vmem:[#allocation2 + $0xf8] sm:$0xff]  ;;  %v114_v31 = vld [vmem:[#allocation2 + $0xe0] sm:$0xff]  ;;  %v552_v33 = vpack.c.bf16 %v115_v24, %v107_v23  ;;  %v108_v35 = vld [vmem:[#allocation2 + $0xb0] sm:$0xff] }
  0x24   :  { %545 = vmatprep.subr.bf16.mxu1 %v544_v48  ;;  %531 = vmatpush1.bf16.msra.mxu0 %v530_v55  ;;  %v568_v34 = vpack.c.bf16 %v117_v26, %v109_v25  ;;  %v116_v36 = vld [vmem:[#allocation2 + $0xf0] sm:$0xff]  ;;  %v123_v37 = vld [vmem:[#allocation2 + $0x128] sm:$0xff]  ;;  %v125_v39 = vld [vmem:[#allocation2 + $0x138] sm:$0xff]  ;;  %v554_v41 = vpack.c.bf16 %v114_v31, %v106_v30 }
  0x25   :  { %549 = vmatprep.subr.bf16.mxu0 %v548_v57  ;;  %v131_v38 = vld [vmem:[#allocation2 + $0x168] sm:$0xff]  ;;  %v133_v40 = vld [vmem:[#allocation2 + $0x178] sm:$0xff]  ;;  %v570_v42 = vpack.c.bf16 %v116_v36, %v108_v35  ;;  %v122_v43 = vld [vmem:[#allocation2 + $0x120] sm:$0xff] }
  0x26   :  { %v130_v44 = vld [vmem:[#allocation2 + $0x160] sm:$0xff]  ;;  %v556_v45 = vpack.c.bf16 %v131_v38, %v123_v37  ;;  %v572_v46 = vpack.c.bf16 %v133_v40, %v125_v39  ;;  %v124_v47 = vld [vmem:[#allocation2 + $0x130] sm:$0xff]  ;;  %v139_v49 = vld [vmem:[#allocation2 + $0x1a8] sm:$0xff] }
  0x27   :  { %547 = vmatpush1.bf16.msra.mxu1 %v546_v56  ;;  %v132_v48 = vld [vmem:[#allocation2 + $0x170] sm:$0xff]  ;;  %v147_v50 = vld [vmem:[#allocation2 + $0x1e8] sm:$0xff]  ;;  %v141_v51 = vld [vmem:[#allocation2 + $0x1b8] sm:$0xff]  ;;  %v558_v53 = vpack.c.bf16 %v130_v44, %v122_v43 }
  0x28   :  { %565 = vmatprep.subr.bf16.mxu1 %v564_v58  ;;  %v149_v52 = vld [vmem:[#allocation2 + $0x1f8] sm:$0xff]  ;;  %v574_v54 = vpack.c.bf16 %v132_v48, %v124_v47  ;;  %v138_v55 = vld [vmem:[#allocation2 + $0x1a0] sm:$0xff]  ;;  %v560_v56 = vpack.c.bf16 %v147_v50, %v139_v49  ;;  %v140_v60 = vld [vmem:[#allocation2 + $0x1b0] sm:$0xff] }
  0x29   :  { %v576_v57 = vpack.c.bf16 %v149_v52, %v141_v51  ;;  %v146_v58 = vld [vmem:[#allocation2 + $0x1e0] sm:$0xff]  ;;  %v148_v63 = vld [vmem:[#allocation2 + $0x1f0] sm:$0xff] }
  0x94   :  { %v41_v2 = vpop.permute.xlu0 %40  ;;  %v67_v4 = vpop.permute.xlu1 %66 }
  0x95   :  { %v47_v6 = vmul.f32 %v46_v0, %v41_v2  ;;  %v73_v15 = vmul.f32 %v72_v9, %v67_v4  ;;  %v562_v0 = vpack.c.bf16 %v146_v58, %v138_v55  ;;  %v578_v2 = vpack.c.bf16 %v148_v63, %v140_v60 }
  0x97   :  { %v54_v13 = vadd.f32 %v511_v8, %v47_v6 }
  0x99   :  { %v57_v11 = vpop.permute.xlu0 %56  ;;  %v77_v12 = vpop.permute.xlu1 %76 }
  0x9a   :  { %v63_v14 = vmul.f32 %v62_v7, %v57_v11  ;;  %v83_v17 = vmul.f32 %v82_v10, %v77_v12 }
  0x9c   :  { %v64_v16 = vadd.f32 %v63_v14, %v54_v13 }
  0x9e   :  { %v74_v20 = vadd.f32 %v73_v15, %v64_v16 }
  0xa0   :  { %v84_v27 = vadd.f32 %v83_v17, %v74_v20 }
  0xa2   :  { %v85_v32 = vmax.f32 %v84_v27, 0.0 }
  0xa4   :  { %512 = vmatmul.mubr.msk.f32.vlgmr.msra.gmra.mrb[0].mxu0 %vm192_vm0, %v85_v32  ;;  %513 = vmatmul.mubr.msk.f32.vlgmr.msra.gmra.mrb[0].mxu1 %vm192_vm0, %v85_v32 }
  0xa5   :  { %551 = vmatpush1.bf16.msra.mxu0 %v550_v28  ;;  %567 = vmatpush1.bf16.msra.mxu1 %v566_v29 }
  0xa6   :  { %553 = vmatprep.subr.bf16.mxu0 %v552_v33  ;;  %569 = vmatprep.subr.bf16.mxu1 %v568_v34 }
  0xa7   :  { %402 = vmatprep.mubr.f32.mxu0 %v665_v59  ;;  %473 = vmatprep.mubr.f32.mxu1 %v665_v59  ;;  %v150_v59 = vld [vmem:[%s771_s4] sm:$0xff]  ;;  %s666_s4 = smov [#allocation5]  }
  0xa8   :  { %v155_v4 = vrot.slane %v150_v59, %v45_v62  ;;  %v163_v6 = vrot.slane %v150_v59, %v71_v3  ;;  %v159_v7 = vrot.slane %v150_v59, %v61_v1  ;;  %v167_v8 = vrot.slane %v150_v59, %v81_v5  ;;  %s502_s11 = sshll.u32 %s666_s4, 4  ;;  %s503_s11 = int_to_ptr.vmem [resolvable:$true] %s502_s11 }
  0xa9   :  { %555 = vmatpush1.bf16.msra.mxu0 %v554_v41  ;;  %571 = vmatpush1.bf16.msra.mxu1 %v570_v42  ;;  %v170_v62 = vsub.s32 4, %v714_v61  ;;  %v178_v3 = vsub.s32 6, %v714_v61  ;;  %v174_v1 = vsub.s32 5, %v714_v61  ;;  %v182_v5 = vsub.s32 7, %v714_v61  ;;  %s632_s12 = scalar_lea.vmem %s503_s11, 1024  ;;  %p637_p9 = scmp.lt.s32.totalorder %s503_s11, %s503_s11 }
  0xaa   :  { %557 = vmatprep.subr.bf16.mxu0 %v556_v45  ;;  %573 = vmatprep.subr.bf16.mxu1 %v572_v46  ;;  %p633_p8 = scmp.ne.s32.totalorder %s503_s11, %s632_s12  ;;  %p638_p10 = scmp.lt.s32.totalorder %s632_s12, %s632_s12 }
  0xab   :  { %v171_v18 = vrot.slane %v150_v59, %v170_v62  ;;  %v179_v19 = vrot.slane %v150_v59, %v178_v3  ;;  %v175_v21 = vrot.slane %v150_v59, %v174_v1  ;;  %v183_v22 = vrot.slane %v150_v59, %v182_v5 }
  0xac   :  { %p639_p11 = por %p638_p10, %p637_p9 }
  0xad   :  { %559 = vmatpush1.bf16.msra.mxu0 %v558_v53  ;;  %575 = vmatpush1.bf16.msra.mxu1 %v574_v54 }
  0xae   :  { %561 = vmatprep.subr.bf16.mxu0 %v560_v56  ;;  %577 = vmatprep.subr.bf16.mxu1 %v576_v57  ;;  %p640_p12 = pnand %p639_p11, %p633_p8 }
  0xb1   :  { %563 = vmatpush1.bf16.msra.mxu0 %v562_v0  ;;  %579 = vmatpush1.bf16.msra.mxu1 %v578_v2 }
  0xb4   :  { %514 = vmatmul.mubr.msk.f32.vlgmr.msra.gmra.mrb[2].mxu0 %vm192_vm0, %v85_v32  ;;  %515 = vmatmul.mubr.msk.f32.vlgmr.msra.gmra.mrb[2].mxu1 %vm192_vm0, %v85_v32 }
 0x177   :  { %v262_v9 = vpop.f32.mrb[0].mxu0  ;;  %v333_v10 = vpop.f32.mrb[0].mxu1 }
 0x178   :  { %v263_v11 = vadd.f32 %v262_v9, %v155_v4  ;;  %v334_v12 = vadd.f32 %v333_v10, %v163_v6  ;;  %v264_v13 = vpop.f32.mrb[1].mxu0  ;;  %v335_v14 = vpop.f32.mrb[1].mxu1 }
 0x179   :  { %v265_v15 = vadd.f32 %v264_v13, %v159_v7  ;;  %v336_v16 = vadd.f32 %v335_v14, %v167_v8 }
 0x17a   :  { %594 = vtanh.f32 %v263_v11 }
 0x17b   :  { %596 = vtanh.f32 %v334_v12 }
 0x17c   :  { %598 = vtanh.f32 %v265_v15 }
 0x17d   :  { %600 = vtanh.f32 %v336_v16 }
 0x184   :  { %v595_v17 = vpop.eup %594 }
 0x185   :  { %v597_v20 = vpop.eup %596  ;;  %488 = vst [vmem:[#allocation5] sm:$0xff] %v595_v17 }
 0x186   :  { %v599_v23 = vpop.eup %598  ;;  %490 = vst [vmem:[#allocation5 + $0x10] sm:$0xff] %v597_v20 }
 0x187   :  { %v601_v24 = vpop.eup %600  ;;  %489 = vst [vmem:[#allocation5 + $0x8] sm:$0xff] %v599_v23  ;;  %v404_v25 = vpop.f32.mrb[2].mxu0 }
 0x188   :  { %v475_v26 = vpop.f32.mrb[2].mxu1  ;;  %491 = vst [vmem:[#allocation5 + $0x18] sm:$0xff] %v601_v24  ;;  %v405_v27 = vadd.f32 %v404_v25, %v171_v18  ;;  %v406_v29 = vpop.f32.mrb[3].mxu0 }
 0x189   :  { %v476_v28 = vadd.f32 %v475_v26, %v179_v19  ;;  %v477_v30 = vpop.f32.mrb[3].mxu1  ;;  %v407_v31 = vadd.f32 %v406_v29, %v175_v21 }
 0x18a   :  { %v478_v61 = vadd.f32 %v477_v30, %v183_v22  ;;  %602 = vtanh.f32 %v405_v27 }
 0x18b   :  { %604 = vtanh.f32 %v476_v28 }
 0x18c   :  { %606 = vtanh.f32 %v407_v31 }
 0x18d   :  { %608 = vtanh.f32 %v478_v61 }
 0x194   :  { %v603_v32 = vpop.eup %602 }
 0x195   :  { %v605_v33 = vpop.eup %604  ;;  %492 = vst [vmem:[#allocation5 + $0x20] sm:$0xff] %v603_v32 }
 0x196   :  { %v607_v34 = vpop.eup %606  ;;  %494 = vst [vmem:[#allocation5 + $0x30] sm:$0xff] %v605_v33 }
 0x197   :  { %v609_v35 = vpop.eup %608  ;;  %493 = vst [vmem:[#allocation5 + $0x28] sm:$0xff] %v607_v34 }
 0x198   :  { %495 = vst [vmem:[#allocation5 + $0x38] sm:$0xff] %v609_v35 }
 0x199   :  { %643 = shalt.err (!%p640_p12)
}
 0x19a   :  { %s644_s15 = scalar_lea.hbm %s772_s5, 1024 }
 0x19b   :  { %p645_p13 = scmp.ne.s32.totalorder %s772_s5, %s644_s15  ;;  %p648_p0 = scmp.lt.u32.totalorder %s644_s15, %s772_s5 }
 0x19d   :  { %p650_p1 = pnand %p648_p0, %p645_p13 }
 0x19f   :  { %653 = shalt.err (!%p650_p1)
}
 0x1a0   :  { %505 = dma.vmem_to_hbm [thread:$0]  %s503_s11, 1024, %s772_s5, [#allocation4]  }
 0x1a1   :  { %656 = dma.done.wait [#allocation4], 1024  }
 0x1a2   :  { %657 = vsyncadd [#allocation4], 4294966272 }
 0x1a3   :  { %509 = vsyncpa [#allocation3], 1 }
 0x1a4   :  { %510 = vsyncpa [#allocation4], 1 }

</bundles_post_ra>
